<compile_context>
chip_gen: v7x
topology: tpu7x:2x2x1
jax: 0.10.0
libtpu: 0.0.40
codegen_flags: <defaults>
</compile_context>

<pallas_src>
import jax
import jax.numpy as jnp
from jax.experimental import pallas as pl
from jax.experimental.pallas import tpu as pltpu


def simple_nn_kernel(x_ref, w1_ref, b1_ref, w2_ref, b2_ref, w3_ref, b3_ref, o_ref):
    # mlp1 + ReLU (hidden dim padded to 128 -> full-width VPU bias-add/ReLU)
    h1 = jnp.dot(x_ref[...], w1_ref[...], preferred_element_type=jnp.float32)
    h1 = jnp.maximum(h1 + b1_ref[...], 0.0)                           # (tb, 128) f32
    # mlp2 (f32 accumulation; inputs possibly bf16)
    h2 = jnp.dot(h1.astype(w2_ref.dtype), w2_ref[...],
                 preferred_element_type=jnp.float32) + b2_ref[...]    # (tb, 20) f32
    # fc3: the N=1 matmul is replaced by a VPU multiply + lane (XLU) reduction,
    # stored lane-dense as a (1, tb) row instead of a masked (tb, 1) column.
    w3 = w3_ref[...].astype(jnp.float32)                              # (1, 20)
    out = jnp.sum(h2 * w3, axis=-1)                                   # (tb,)
    o_ref[...] = (out[None, :] + b3_ref[...]).astype(o_ref.dtype)     # (1, tb)


def simple_nn_forward(x, params, *, block_rows=1024, hidden_pad=128,
                      compute_dtype=None):
    """SimpleNN forward: x (batch, 20) -> (batch, 1).

    block_rows:   batch tile (kept a multiple of 128). 512-8192 keeps the kernel
                  on the HBM roofline while fitting comfortably in scoped VMEM on
                  v5e (16 MiB) / v6e (32 MiB) / v7x (32 of 64 MiB).
    compute_dtype: e.g. jnp.bfloat16 to halve HBM traffic for the MXU passes
                  (accumulation stays f32).  None keeps everything f32.

    NOTE: for tiny batches (<~128 rows) plain XLA (jnp) is at least as fast as
    any Pallas kernel for this ~3 KFLOP layer; the kernel pays off when it is
    streaming large batches (or is fused into a bigger per-step pipeline).
    """
    w1, b1, w2, b2, w3, b3 = params
    batch, in_dim = x.shape
    hidden = w1.shape[1]
    out_dim = w2.shape[1]

    # ---- one-time weight layout prep (O(KB)) --------------------------------
    hp = max(hidden_pad, ((hidden + 127) // 128) * 128)               # 50 -> 128
    w1p = jnp.zeros((in_dim, hp), jnp.float32).at[:, :hidden].set(w1)
    b1p = jnp.zeros((1, hp), jnp.float32).at[:, :hidden].set(b1)
    w2p = jnp.zeros((hp, out_dim), jnp.float32).at[:hidden, :].set(w2)
    w3r = jnp.reshape(w3, (1, out_dim))                               # row for VPU fc3
    b3r = jnp.reshape(b3, (1, 1))

    if compute_dtype is not None:        # bf16 MXU path; biases / accum stay f32
        x = x.astype(compute_dtype)
        w1p = w1p.astype(compute_dtype)
        w2p = w2p.astype(compute_dtype)
        w3r = w3r.astype(compute_dtype)

    # ---- batch tiling --------------------------------------------------------
    tb = min(block_rows, max(128, ((batch + 127) // 128) * 128))
    tb = ((tb + 127) // 128) * 128                                    # mult of 128
    padded_batch = ((batch + tb - 1) // tb) * tb
    if padded_batch != batch:
        x = jnp.zeros((padded_batch, in_dim), x.dtype).at[:batch, :].set(x)
    num_tiles = padded_batch // tb

    resident = lambda a: pl.BlockSpec(a.shape, lambda i: (0, 0))      # VMEM-resident

    flops = int(2 * padded_batch * (in_dim * hp + hp * out_dim + out_dim))
    bytes_accessed = int(padded_batch * (in_dim * x.dtype.itemsize + 4)
                         + (w1p.size + w2p.size) * w1p.dtype.itemsize)

    out_row = pl.pallas_call(
        simple_nn_kernel,
        out_shape=jax.ShapeDtypeStruct((1, padded_batch), jnp.float32),
        grid_spec=pltpu.PrefetchScalarGridSpec(
            num_scalar_prefetch=0,
            grid=(num_tiles,),
            in_specs=[
                pl.BlockSpec((tb, in_dim), lambda i: (i, 0)),   # streamed x tiles
                resident(w1p), resident(b1p),
                resident(w2p), resident(b2),
                resident(w3r), resident(b3r),
            ],
            out_specs=pl.BlockSpec((1, tb), lambda i: (0, i)),  # lane-dense output
        ),
        compiler_params=pltpu.CompilerParams(
            dimension_semantics=("parallel",),                  # 2x on v7x dual-TC
        ),
        cost_estimate=pl.CostEstimate(
            flops=flops, transcendentals=0, bytes_accessed=bytes_accessed),
    )(x, w1p, b1p, w2p, b2, w3r, b3r)

    return out_row[0, :batch].reshape(batch, 1)


def init_params(key):
    """Deterministic init mimicking torch.nn.Linear default U(-1/sqrt(fan_in), ...)."""
    def linear(key, fan_in, fan_out):
        kw, kb = jax.random.split(key)
        bound = 1.0 / jnp.sqrt(fan_in)
        w = jax.random.uniform(kw, (fan_in, fan_out), jnp.float32, -bound, bound)
        b = jax.random.uniform(kb, (1, fan_out), jnp.float32, -bound, bound)
        return w, b

    k1, k2, k3 = jax.random.split(key, 3)
    w1, b1 = linear(k1, 20, 50)   # mlp1
    w2, b2 = linear(k2, 50, 20)   # mlp2
    w3, b3 = linear(k3, 20, 1)    # fc3
    return (w1, b1, w2, b2, w3, b3)


if __name__ == "__main__":
    key = jax.random.PRNGKey(0)
    kx, kp = jax.random.split(key)
    batch = 8
    x = jax.random.normal(kx, (batch, 20), jnp.float32)
    params = init_params(kp)
    w1, b1, w2, b2, w3, b3 = params

    # plain-JAX reference
    ref = jnp.maximum(x @ w1 + b1, 0.0) @ w2 + b2
    ref = ref @ w3 + b3

    # f32 path: tight tolerance
    out = simple_nn_forward(x, params)
    jax.block_until_ready(out)
    assert out.shape == (batch, 1)
    assert jnp.allclose(out, ref, atol=1e-5, rtol=1e-5)

    # bf16 MXU path (halves HBM traffic at large batch); inputs rounded to bf16
    # so tolerance is loosened accordingly (accumulation remains f32).
    out_bf16 = simple_nn_forward(x, params, compute_dtype=jnp.bfloat16)
    jax.block_until_ready(out_bf16)
    assert out_bf16.shape == (batch, 1)
    assert jnp.allclose(out_bf16, ref, atol=5e-2, rtol=5e-2)

    print("KERNEL_OK")
</pallas_src>

<mosaic_0001>
module attributes {stable_mosaic.version = 11 : i64} {
  func.func @simple_nn_kernel(%arg0: i32, %arg1: memref<128x20xf32, #tpu.memory_space<vmem>>, %arg2: memref<20x128xf32, #tpu.memory_space<vmem>>, %arg3: memref<1x128xf32, #tpu.memory_space<vmem>>, %arg4: memref<128x20xf32, #tpu.memory_space<vmem>>, %arg5: memref<1x20xf32, #tpu.memory_space<vmem>>, %arg6: memref<1x20xf32, #tpu.memory_space<vmem>>, %arg7: memref<1x1xf32, #tpu.memory_space<vmem>>, %arg8: memref<1x128xf32, #tpu.memory_space<vmem>>) attributes {dimension_semantics = [#tpu.dimension_semantics<parallel>], iteration_bounds = array<i64: 1>, scalar_prefetch = 0 : i64, scratch_operands = 0 : i64, tpu.core_type = #tpu.core_type<tc>, window_params = [{transform_indices = @transform_0, window_bounds = array<i64: 128, 20>}, {pipeline_mode = #tpu.pipeline_mode<synchronous>, transform_indices = @transform_1, window_bounds = array<i64: 20, 128>}, {pipeline_mode = #tpu.pipeline_mode<synchronous>, transform_indices = @transform_2, window_bounds = array<i64: 1, 128>}, {pipeline_mode = #tpu.pipeline_mode<synchronous>, transform_indices = @transform_3, window_bounds = array<i64: 128, 20>}, {pipeline_mode = #tpu.pipeline_mode<synchronous>, transform_indices = @transform_4, window_bounds = array<i64: 1, 20>}, {pipeline_mode = #tpu.pipeline_mode<synchronous>, transform_indices = @transform_5, window_bounds = array<i64: 1, 20>}, {pipeline_mode = #tpu.pipeline_mode<synchronous>, transform_indices = @transform_6, window_bounds = array<i64: 1, 1>}, {transform_indices = @transform_7, window_bounds = array<i64: 1, 128>}]} {
    %c0 = arith.constant 0 : index
    %c0_0 = arith.constant 0 : index
    %0 = vector.load %arg1[%c0, %c0_0] : memref<128x20xf32, #tpu.memory_space<vmem>>, vector<128x20xf32>
    %c0_1 = arith.constant 0 : index
    %c0_2 = arith.constant 0 : index
    %1 = vector.load %arg2[%c0_1, %c0_2] : memref<20x128xf32, #tpu.memory_space<vmem>>, vector<20x128xf32>
    %cst = arith.constant dense<0.000000e+00> : vector<128x128xf32>
    %2 = tpu.matmul %0, %1, %cst {dimension_numbers = #tpu.dot_dimension_numbers<[1], [0], [0], [1], [0, 0, 1, 1], [], []>} : vector<128x20xf32>, vector<20x128xf32>, vector<128x128xf32> -> vector<128x128xf32>
    %c0_3 = arith.constant 0 : index
    %c0_4 = arith.constant 0 : index
    %3 = vector.load %arg3[%c0_3, %c0_4] : memref<1x128xf32, #tpu.memory_space<vmem>>, vector<1x128xf32>
    %4 = vector.broadcast %3 : vector<1x128xf32> to vector<128x128xf32>
    %5 = arith.addf %2, %4 : vector<128x128xf32>
    %cst_5 = arith.constant 0.000000e+00 : f32
    %6 = vector.broadcast %cst_5 : f32 to vector<128x128xf32>
    %7 = arith.maximumf %5, %6 : vector<128x128xf32>
    %c0_6 = arith.constant 0 : index
    %c0_7 = arith.constant 0 : index
    %8 = vector.load %arg4[%c0_6, %c0_7] : memref<128x20xf32, #tpu.memory_space<vmem>>, vector<128x20xf32>
    %cst_8 = arith.constant dense<0.000000e+00> : vector<128x20xf32>
    %9 = tpu.matmul %7, %8, %cst_8 {dimension_numbers = #tpu.dot_dimension_numbers<[1], [0], [0], [1], [0, 0, 1, 1], [], []>} : vector<128x128xf32>, vector<128x20xf32>, vector<128x20xf32> -> vector<128x20xf32>
    %c0_9 = arith.constant 0 : index
    %c0_10 = arith.constant 0 : index
    %10 = vector.load %arg5[%c0_9, %c0_10] : memref<1x20xf32, #tpu.memory_space<vmem>>, vector<1x20xf32>
    %11 = vector.broadcast %10 : vector<1x20xf32> to vector<128x20xf32>
    %12 = arith.addf %9, %11 : vector<128x20xf32>
    %c0_11 = arith.constant 0 : index
    %c0_12 = arith.constant 0 : index
    %13 = vector.load %arg6[%c0_11, %c0_12] : memref<1x20xf32, #tpu.memory_space<vmem>>, vector<1x20xf32>
    %14 = vector.broadcast %13 : vector<1x20xf32> to vector<128x20xf32>
    %15 = arith.mulf %12, %14 : vector<128x20xf32>
    %cst_13 = arith.constant dense<0.000000e+00> : vector<128xf32>
    %16 = vector.multi_reduction <add>, %15, %cst_13 [1] : vector<128x20xf32> to vector<128xf32>
    %17 = vector.shape_cast %16 : vector<128xf32> to vector<1x128xf32>
    %c0_14 = arith.constant 0 : index
    %c0_15 = arith.constant 0 : index
    %18 = vector.load %arg7[%c0_14, %c0_15] : memref<1x1xf32, #tpu.memory_space<vmem>>, vector<1x1xf32>
    %19 = vector.broadcast %18 : vector<1x1xf32> to vector<1x128xf32>
    %20 = arith.addf %17, %19 : vector<1x128xf32>
    %c0_16 = arith.constant 0 : index
    %c0_17 = arith.constant 0 : index
    %21 = vector.load %arg8[%c0_16, %c0_17] : memref<1x128xf32, #tpu.memory_space<vmem>>, vector<1x128xf32>
    tpu.vector_store %arg8[%c0_16, %c0_17], %20 {strides = array<i32>} : memref<1x128xf32, #tpu.memory_space<vmem>>, vector<1x128xf32>,
    return
  }
  func.func @transform_0(%arg0: i32) -> (i32, i32) {
    %c0_i32 = arith.constant 0 : i32
    %c0_i32_0 = arith.constant 0 : i32
    return %arg0, %c0_i32 : i32, i32
  }
  func.func @transform_1(%arg0: i32) -> (i32, i32) {
    %c0_i32 = arith.constant 0 : i32
    %c0_i32_0 = arith.constant 0 : i32
    %c0_i32_1 = arith.constant 0 : i32
    return %c0_i32, %c0_i32_0 : i32, i32
  }
  func.func @transform_2(%arg0: i32) -> (i32, i32) {
    %c0_i32 = arith.constant 0 : i32
    %c0_i32_0 = arith.constant 0 : i32
    %c0_i32_1 = arith.constant 0 : i32
    return %c0_i32, %c0_i32_0 : i32, i32
  }
  func.func @transform_3(%arg0: i32) -> (i32, i32) {
    %c0_i32 = arith.constant 0 : i32
    %c0_i32_0 = arith.constant 0 : i32
    %c0_i32_1 = arith.constant 0 : i32
    return %c0_i32, %c0_i32_0 : i32, i32
  }
  func.func @transform_4(%arg0: i32) -> (i32, i32) {
    %c0_i32 = arith.constant 0 : i32
    %c0_i32_0 = arith.constant 0 : i32
    %c0_i32_1 = arith.constant 0 : i32
    return %c0_i32, %c0_i32_0 : i32, i32
  }
  func.func @transform_5(%arg0: i32) -> (i32, i32) {
    %c0_i32 = arith.constant 0 : i32
    %c0_i32_0 = arith.constant 0 : i32
    %c0_i32_1 = arith.constant 0 : i32
    return %c0_i32, %c0_i32_0 : i32, i32
  }
  func.func @transform_6(%arg0: i32) -> (i32, i32) {
    %c0_i32 = arith.constant 0 : i32
    %c0_i32_0 = arith.constant 0 : i32
    %c0_i32_1 = arith.constant 0 : i32
    return %c0_i32, %c0_i32_0 : i32, i32
  }
  func.func @transform_7(%arg0: i32) -> (i32, i32) {
    %c0_i32 = arith.constant 0 : i32
    %c0_i32_0 = arith.constant 0 : i32
    return %c0_i32, %arg0 : i32, i32
  }
}

</mosaic_0001>

<bundles_post_ra>
// kernel: tpu_custom_call.1
= control target key start
LH: loop header
LB: loop body
LE: loop exit
PB: predicated region body
PF: predicated region fallthrough
CT: control target
= control target key end

     0   :  { %s1210_s0 = inlined_call_operand.vmem [shape: f32[128,20], index: 0, kind: input, shape index: {}]   ;;  %s1211_s1 = inlined_call_operand.vmem [shape: f32[20,128], index: 1, kind: input, shape index: {}]   ;;  %s1212_s2 = inlined_call_operand.vmem [shape: f32[1,128], index: 2, kind: input, shape index: {}]   ;;  %s1213_s3 = inlined_call_operand.vmem [shape: f32[128,20], index: 3, kind: input, shape index: {}]   ;;  %s1214_s4 = inlined_call_operand.vmem [shape: f32[1,20], index: 4, kind: input, shape index: {}]   ;;  %s1215_s5 = inlined_call_operand.vmem [shape: f32[1,20], index: 5, kind: input, shape index: {}]   ;;  %s1216_s6 = inlined_call_operand.<no memory space> [shape: f32[1,1], index: 6, kind: input, shape index: {}]   ;;  %s1217_s7 = inlined_call_operand.hbm [shape: f32[1,128], index: 7, kind: output, shape index: {}]  }
   0x1   :  { %v12_v0 = vstv %s1216_s6 }
   0x2   :  { %13 = vst [vmem:[#allocation2] sm:$0x1] %v12_v0 }
   0x3   :  { %v45_v1 = vld [vmem:[%s1211_s1] sm:$0xff]  ;;  %v46_v2 = vld [vmem:[%s1211_s1 + $0x8] sm:$0xff]  ;;  %vm55_vm0 = vcmask 162816   ;;  %v47_v5 = vld [vmem:[%s1211_s1 + $0x10] sm:$0xf]  ;;  %vm104_vm1 = vcmask 1043456  }
   0x4   :  { %v834_v3 = vpack.c.bf16 %v46_v2, %v45_v1  ;;  %v29_v4 = vld [vmem:[%s1210_s0] sm:$0xff]  ;;  %v30_v6 = vld [vmem:[%s1210_s0 + $0x8] sm:$0xff]  ;;  %v31_v9 = vld [vmem:[%s1210_s0 + $0x10] sm:$0xff] }
   0x5   :  { %754 = vmatprep.mubr.msk.f32.mxu0 %vm55_vm0, %v29_v4  ;;  %v269_v7 = vld [vmem:[%s1213_s3] sm:$0xff]  ;;  %v270_v8 = vld [vmem:[%s1213_s3 + $0x8] sm:$0xff]  ;;  %v271_v11 = vld [vmem:[%s1213_s3 + $0x10] sm:$0xff] }
   0x6   :  { %835 = vmatprep.subr.bf16.mxu0 %v834_v3  ;;  %v838_v10 = vpack.c.bf16 %v270_v8, %v269_v7  ;;  %v272_v12 = vld [vmem:[%s1213_s3 + $0x18] sm:$0xff]  ;;  %v273_v14 = vld [vmem:[%s1213_s3 + $0x20] sm:$0xff]  ;;  %v274_v15 = vld [vmem:[%s1213_s3 + $0x28] sm:$0xff] }
   0x7   :  { %837 = vmatpush3.bf16.msra.mxu0 %v834_v3  ;;  %v842_v13 = vpack.c.bf16 %v272_v12, %v271_v11  ;;  %v32_v16 = vld [vmem:[%s1210_s0 + $0x18] sm:$0xff]  ;;  %v33_v17 = vld [vmem:[%s1210_s0 + $0x20] sm:$0xff]  ;;  %v846_v18 = vpack.c.bf16 %v274_v15, %v273_v14 }
   0x8   :  { %752 = vmatprep.subr.msk.mxu0 %vm104_vm1, %v47_v5  ;;  %870 = vmatprep.subr.bf16.mxu1 %v838_v10 }
   0xb   :  { %753 = vmatpush3.msk.msra.mxu0 %vm104_vm1, %v47_v5 }
   0xc   :  { %755 = vmatmul.mubr.msk.f32.vlgmr.msra.gmra.mrb[0].mxu0 %vm55_vm0, %v30_v6  ;;  %839 = vmatprep.subr.bf16.mxu0 %v838_v10 }
   0xd   :  { %757 = vmatprep.mubr.msk.f32.mxu0 %vm55_vm0, %v31_v9  ;;  %841 = vmatpush3.bf16.msra.mxu0 %v838_v10 }
   0xe   :  { %843 = vmatprep.subr.bf16.mxu0 %v842_v13 }
   0xf   :  { %14 = vsyncpa [#allocation4], 0  ;;  %v275_v19 = vld [vmem:[%s1213_s3 + $0x30] sm:$0xff]  ;;  %v276_v20 = vld [vmem:[%s1213_s3 + $0x38] sm:$0xff]  ;;  %878 = vmatpush3.bf16.msra.mxu1 %v838_v10  ;;  %vm561_vm2 = vcmask 130112   ;;  %vm568_vm3 = vcmask 195712  }
  0x10   :  { %758 = vmatmul.mubr.msk.f32.gmra.mrb[2].mxu0 %vm55_vm0, %v32_v16  ;;  %871 = vmatprep.subr.bf16.mxu1 %v842_v13  ;;  %v34_v21 = vld [vmem:[%s1210_s0 + $0x28] sm:$0xff]  ;;  %v35_v22 = vld [vmem:[%s1210_s0 + $0x30] sm:$0xff]  ;;  %v850_v23 = vpack.c.bf16 %v276_v20, %v275_v19  ;;  %v277_v24 = vld [vmem:[%s1213_s3 + $0x40] sm:$0xff]  ;;  %vm575_vm4 = vcmask 261312   ;;  %vm582_vm5 = vcmask 326912   ;;  %vm589_vm6 = vcmask 392512  }
  0x11   :  { %760 = vmatprep.mubr.msk.f32.mxu0 %vm55_vm0, %v33_v17  ;;  %845 = vmatpush3.bf16.msra.mxu0 %v842_v13  ;;  %v278_v25 = vld [vmem:[%s1213_s3 + $0x48] sm:$0xff]  ;;  %v36_v26 = vld [vmem:[%s1210_s0 + $0x38] sm:$0xff]  ;;  %v37_v27 = vld [vmem:[%s1210_s0 + $0x40] sm:$0xff]  ;;  %vm596_vm7 = vcmask 458112   ;;  %vm603_vm8 = vcmask 523712   ;;  %vm610_vm9 = vcmask 589312  }
  0x12   :  { %847 = vmatprep.subr.bf16.mxu0 %v846_v18  ;;  %v854_v28 = vpack.c.bf16 %v278_v25, %v277_v24  ;;  %v279_v29 = vld [vmem:[%s1213_s3 + $0x50] sm:$0xff]  ;;  %v280_v30 = vld [vmem:[%s1213_s3 + $0x58] sm:$0xff]  ;;  %v38_v31 = vld [vmem:[%s1210_s0 + $0x48] sm:$0xff]  ;;  %vm617_vm10 = vcmask 654912   ;;  %vm624_vm11 = vcmask 720512   ;;  %vm631_vm12 = vcmask 786112  }
  0x13   :  { %879 = vmatpush3.bf16.msra.mxu1 %v842_v13  ;;  %v39_v32 = vld [vmem:[%s1210_s0 + $0x50] sm:$0xff]  ;;  %v858_v33 = vpack.c.bf16 %v280_v30, %v279_v29  ;;  %v281_v34 = vld [vmem:[%s1213_s3 + $0x60] sm:$0xff]  ;;  %v282_v35 = vld [vmem:[%s1213_s3 + $0x68] sm:$0xff]  ;;  %v914_v30 = vmov 0   ;;  %vm638_vm13 = vcmask 851712   ;;  %vm645_vm14 = vcmask 917312  }
  0x14   :  { %761 = vmatmul.mubr.msk.f32.gmra.mrb[4].mxu0 %vm55_vm0, %v34_v21  ;;  %872 = vmatprep.subr.bf16.mxu1 %v846_v18  ;;  %v40_v36 = vld [vmem:[%s1210_s0 + $0x58] sm:$0xff]  ;;  %v41_v37 = vld [vmem:[%s1210_s0 + $0x60] sm:$0xff]  ;;  %v862_v38 = vpack.c.bf16 %v282_v35, %v281_v34  ;;  %v42_v39 = vld [vmem:[%s1210_s0 + $0x68] sm:$0xff]  ;;  %vm652_vm15 = vcmask 982912  }
  0x15   :  { %763 = vmatprep.mubr.msk.f32.mxu0 %vm55_vm0, %v35_v22  ;;  %849 = vmatpush3.bf16.msra.mxu0 %v846_v18  ;;  %v43_v40 = vld [vmem:[%s1210_s0 + $0x70] sm:$0xff]  ;;  %v44_v41 = vld [vmem:[%s1210_s0 + $0x78] sm:$0xff]  ;;  %v677_v45 = vld [vmem:[%s1212_s2] ss:$0 sm:$0xff] }
  0x16   :  { %851 = vmatprep.subr.bf16.mxu0 %v850_v23  ;;  %v283_v42 = vld [vmem:[%s1213_s3 + $0x70] sm:$0xff]  ;;  %v284_v43 = vld [vmem:[%s1213_s3 + $0x78] sm:$0xff]  ;;  %888 = vset.pattern.permute.xlu1 %v914_v30 }
  0x17   :  { %880 = vmatpush3.bf16.msra.mxu1 %v846_v18  ;;  %v866_v44 = vpack.c.bf16 %v284_v43, %v283_v42  ;;  %889 = vset.pattern.permute.xlu0 %v914_v30 }
  0x18   :  { %764 = vmatmul.mubr.msk.f32.gmra.mrb[6].mxu0 %vm55_vm0, %v36_v26  ;;  %873 = vmatprep.subr.bf16.mxu1 %v850_v23 }
  0x19   :  { %766 = vmatprep.mubr.msk.f32.mxu0 %vm55_vm0, %v37_v27  ;;  %853 = vmatpush3.bf16.msra.mxu0 %v850_v23 }
  0x1a   :  { %855 = vmatprep.subr.bf16.mxu0 %v854_v28 }
  0x1b   :  { %881 = vmatpush3.bf16.msra.mxu1 %v850_v23 }
  0x1c   :  { %767 = vmatmul.mubr.msk.f32.gmra.mrb[8].mxu0 %vm55_vm0, %v38_v31  ;;  %874 = vmatprep.subr.bf16.mxu1 %v854_v28  ;;  %v1086_v31 = vld [vmem:[%s1214_s4] ss:$0 sm:$0xff]  ;;  %s915_s4 = smov [#allocation3]  }
  0x1d   :  { %769 = vmatprep.mubr.msk.f32.mxu0 %vm55_vm0, %v39_v32  ;;  %857 = vmatpush3.bf16.msra.mxu0 %v854_v28 }
  0x1e   :  { %859 = vmatprep.subr.bf16.mxu0 %v858_v33 }
  0x1f   :  { %882 = vmatpush3.bf16.msra.mxu1 %v854_v28 }
  0x20   :  { %770 = vmatmul.mubr.msk.f32.gmra.mrb[10].mxu0 %vm55_vm0, %v40_v36  ;;  %875 = vmatprep.subr.bf16.mxu1 %v858_v33 }
  0x21   :  { %772 = vmatprep.mubr.msk.f32.mxu0 %vm55_vm0, %v41_v37  ;;  %861 = vmatpush3.bf16.msra.mxu0 %v858_v33 }
  0x22   :  { %863 = vmatprep.subr.bf16.mxu0 %v862_v38 }
  0x23   :  { %883 = vmatpush3.bf16.msra.mxu1 %v858_v33  ;;  %v1091_v33 = vld [vmem:[%s1215_s5] ss:$0 sm:$0xff]  ;;  %s669_s5 = sshll.u32 %s915_s4, 4  ;;  %s670_s5 = int_to_ptr.vmem [resolvable:$true] %s669_s5 }
  0x24   :  { %773 = vmatmul.mubr.msk.f32.gmra.mrb[12].mxu0 %vm55_vm0, %v42_v39  ;;  %876 = vmatprep.subr.bf16.mxu1 %v862_v38  ;;  %s890_s24 = scalar_lea.vmem %s670_s5, 16  ;;  %s894_s25 = scalar_lea.vmem %s670_s5, 32 }
  0x25   :  { %775 = vmatprep.mubr.msk.f32.mxu0 %vm55_vm0, %v43_v40  ;;  %865 = vmatpush3.bf16.msra.mxu0 %v862_v38  ;;  %p891_p0 = scmp.ne.s32.totalorder %s670_s5, %s890_s24  ;;  %p895_p1 = scmp.lt.s32.totalorder %s670_s5, %s670_s5 }
  0x26   :  { %867 = vmatprep.subr.bf16.mxu0 %v866_v44  ;;  %p896_p2 = scmp.lt.s32.totalorder %s894_s25, %s890_s24 }
  0x27   :  { %884 = vmatpush3.bf16.msra.mxu1 %v862_v38 }
  0x28   :  { %776 = vmatmul.mubr.msk.f32.gmra.mrb[14].mxu0 %vm55_vm0, %v44_v41  ;;  %877 = vmatprep.subr.bf16.mxu1 %v866_v44  ;;  %p897_p3 = por %p896_p2, %p895_p1 }
  0x29   :  { %869 = vmatpush3.bf16.msra.mxu0 %v866_v44 }
  0x2a   :  { %p898_p4 = pnand %p897_p3, %p891_p0 }
  0x2b   :  { %885 = vmatpush3.bf16.msra.mxu1 %v866_v44 }
  0xdf   :  { %v756_v46 = vpop.f32.mrb[0].mxu0 }
  0xe0   :  { %v180_v47 = vadd.f32 %v756_v46, %v677_v45  ;;  %v174_v48 = vpop.f32.mrb[1].mxu0 }
  0xe1   :  { %v175_v49 = vadd.f32 %v677_v45, %v174_v48 }
  0xe2   :  { %v254_v52 = vmax.f32 %v180_v47, 0.0 }
  0xe3   :  { %v253_v50 = vmax.f32 %v175_v49, 0.0  ;;  %v759_v51 = vpop.f32.mrb[2].mxu0 }
  0xe4   :  { %v190_v53 = vadd.f32 %v759_v51, %v677_v45  ;;  %v184_v54 = vpop.f32.mrb[3].mxu0 }
  0xe5   :  { %v185_v55 = vadd.f32 %v677_v45, %v184_v54  ;;  %810 = vmatprep.mubr.f32.mxu0 %v253_v50 }
  0xe6   :  { %811 = vmatmul.mubr.f32.vlgmr.msra.gmra.mrb[16].mxu0 %v254_v52  ;;  %v256_v58 = vmax.f32 %v190_v53, 0.0 }
  0xe7   :  { %v255_v56 = vmax.f32 %v185_v55, 0.0  ;;  %v762_v57 = vpop.f32.mrb[4].mxu0 }
  0xe8   :  { %v200_v59 = vadd.f32 %v762_v57, %v677_v45  ;;  %v194_v60 = vpop.f32.mrb[5].mxu0 }
  0xe9   :  { %v195_v61 = vadd.f32 %v677_v45, %v194_v60  ;;  %813 = vmatprep.mubr.f32.mxu0 %v255_v56 }
  0xea   :  { %v258_v62 = vmax.f32 %v200_v59, 0.0  ;;  %814 = vmatmul.mubr.f32.gmra.mrb[18].mxu0 %v256_v58 }
  0xeb   :  { %v257_v63 = vmax.f32 %v195_v61, 0.0  ;;  %v765_v0 = vpop.f32.mrb[6].mxu0 }
  0xec   :  { %v210_v1 = vadd.f32 %v765_v0, %v677_v45  ;;  %v204_v2 = vpop.f32.mrb[7].mxu0 }
  0xed   :  { %816 = vmatprep.mubr.f32.mxu0 %v257_v63  ;;  %v205_v3 = vadd.f32 %v677_v45, %v204_v2 }
  0xee   :  { %v260_v4 = vmax.f32 %v210_v1, 0.0  ;;  %817 = vmatmul.mubr.f32.gmra.mrb[20].mxu0 %v258_v62 }
  0xef   :  { %v259_v5 = vmax.f32 %v205_v3, 0.0  ;;  %v768_v6 = vpop.f32.mrb[8].mxu0 }
  0xf0   :  { %v220_v7 = vadd.f32 %v768_v6, %v677_v45  ;;  %v214_v8 = vpop.f32.mrb[9].mxu0 }
  0xf1   :  { %819 = vmatprep.mubr.f32.mxu1 %v259_v5  ;;  %v215_v9 = vadd.f32 %v677_v45, %v214_v8 }
  0xf2   :  { %820 = vmatmul.mubr.f32.vlgmr.msra.gmra.mrb[0].mxu1 %v260_v4  ;;  %v262_v10 = vmax.f32 %v220_v7, 0.0 }
  0xf3   :  { %v261_v11 = vmax.f32 %v215_v9, 0.0  ;;  %v771_v12 = vpop.f32.mrb[10].mxu0 }
  0xf4   :  { %v230_v13 = vadd.f32 %v771_v12, %v677_v45  ;;  %v224_v14 = vpop.f32.mrb[11].mxu0 }
  0xf5   :  { %822 = vmatprep.mubr.f32.mxu1 %v261_v11  ;;  %v225_v15 = vadd.f32 %v677_v45, %v224_v14 }
  0xf6   :  { %v264_v16 = vmax.f32 %v230_v13, 0.0  ;;  %823 = vmatmul.mubr.f32.gmra.mrb[2].mxu1 %v262_v10 }
  0xf7   :  { %v263_v17 = vmax.f32 %v225_v15, 0.0  ;;  %v774_v18 = vpop.f32.mrb[12].mxu0 }
  0xf8   :  { %v240_v19 = vadd.f32 %v774_v18, %v677_v45  ;;  %v234_v20 = vpop.f32.mrb[13].mxu0 }
  0xf9   :  { %v235_v21 = vadd.f32 %v677_v45, %v234_v20  ;;  %825 = vmatprep.mubr.f32.mxu1 %v263_v17  ;;  %v508_v20 = vld [vmem:[#allocation2] sm:$0x1] }
  0xfa   :  { %v266_v22 = vmax.f32 %v240_v19, 0.0  ;;  %826 = vmatmul.mubr.f32.gmra.mrb[4].mxu1 %v264_v16 }
  0xfb   :  { %v265_v23 = vmax.f32 %v235_v21, 0.0  ;;  %v777_v24 = vpop.f32.mrb[14].mxu0 }
  0xfc   :  { %v250_v25 = vadd.f32 %v777_v24, %v677_v45  ;;  %v244_v26 = vpop.f32.mrb[15].mxu0 }
  0xfd   :  { %828 = vmatprep.mubr.f32.mxu1 %v265_v23  ;;  %v245_v27 = vadd.f32 %v677_v45, %v244_v26 }
  0xfe   :  { %v268_v28 = vmax.f32 %v250_v25, 0.0  ;;  %829 = vmatmul.mubr.f32.gmra.mrb[6].mxu1 %v266_v22 }
  0xff   :  { %v267_v29 = vmax.f32 %v245_v27, 0.0 }
 0x101   :  { %831 = vmatprep.mubr.f32.mxu1 %v267_v29 }
 0x102   :  { %832 = vmatmul.mubr.f32.gmra.mrb[8].mxu1 %v268_v28 }
 0x1b9   :  { %v812_v32 = vpop.f32.mrb[16].mxu0 }
 0x1ba   :  { %v364_v34 = vadd.f32 %v812_v32, %v1086_v31  ;;  %v358_v35 = vpop.f32.mrb[17].mxu0 }
 0x1bb   :  { %v359_v36 = vadd.f32 %v1086_v31, %v358_v35 }
 0x1bc   :  { %v445_v37 = vmul.f32 %v1091_v33, %v364_v34 }
 0x1bd   :  { %v815_v38 = vpop.f32.mrb[18].mxu0  ;;  %v444_v42 = vmul.f32 %v1091_v33, %v359_v36 }
 0x1be   :  { %v374_v39 = vadd.f32 %v815_v38, %v1086_v31  ;;  %v368_v40 = vpop.f32.mrb[19].mxu0  ;;  %v463_v41 = vsel %vm55_vm0, %v445_v37, 0.0 }
 0x1bf   :  { %v369_v43 = vadd.f32 %v1086_v31, %v368_v40  ;;  %464 = vadd.xlane.f32.xlu0 %v463_v41  ;;  %v460_v49 = vsel %vm55_vm0, %v444_v42, 0.0  ;;  %v514_v41 = vlaneseq }
 0x1c0   :  { %v447_v44 = vmul.f32 %v1091_v33, %v374_v39 }
 0x1c1   :  { %v818_v45 = vpop.f32.mrb[20].mxu0  ;;  %v446_v50 = vmul.f32 %v1091_v33, %v369_v43 }
 0x1c2   :  { %v384_v46 = vadd.f32 %v818_v45, %v1086_v31  ;;  %v378_v47 = vpop.f32.mrb[21].mxu0  ;;  %v469_v48 = vsel %vm55_vm0, %v447_v44, 0.0  ;;  %v1141_v44 = vshrl.u32 %v514_v41, 7  ;;  %v1144_v45 = vand.u32 127, %v514_v41 }
 0x1c3   :  { %v379_v51 = vadd.f32 %v1086_v31, %v378_v47  ;;  %470 = vadd.xlane.f32.xlu1 %v469_v48  ;;  %461 = vadd.xlane.f32.xlu0 %v460_v49  ;;  %v466_v55 = vsel %vm55_vm0, %v446_v50, 0.0 }
 0x1c4   :  { %v449_v57 = vmul.f32 %v1091_v33, %v384_v46  ;;  %v556_v49 = vadd.s32 4294967288, %v1144_v45  ;;  %v563_v50 = vadd.s32 4294967280, %v1144_v45  ;;  %v640_v41 = vadd.s32 4294967192, %v1144_v45 }
 0x1c5   :  { %v821_v52 = vpop.f32.mrb[0].mxu1  ;;  %v448_v53 = vmul.f32 %v1091_v33, %v379_v51 }
 0x1c6   :  { %v394_v54 = vadd.f32 %v821_v52, %v1086_v31  ;;  %v388_v56 = vpop.f32.mrb[1].mxu1  ;;  %v475_v63 = vsel %vm55_vm0, %v449_v57, 0.0  ;;  %v566_v57 = vsub.s32 %v563_v50, %v1141_v44 }
 0x1c7   :  { %467 = vadd.xlane.f32.xlu1 %v466_v55  ;;  %v472_v58 = vsel %vm55_vm0, %v448_v53, 0.0  ;;  %v389_v59 = vadd.f32 %v1086_v31, %v388_v56  ;;  %v559_v55 = vsub.s32 %v556_v49, %v1141_v44 }
 0x1c8   :  { %473 = vadd.xlane.f32.xlu0 %v472_v58  ;;  %v451_v60 = vmul.f32 %v1091_v33, %v394_v54  ;;  %v554_v54 = vsub.s32 %v1144_v45, %v1141_v44 }
 0x1c9   :  { %v824_v61 = vpop.f32.mrb[2].mxu1  ;;  %v450_v62 = vmul.f32 %v1091_v33, %v389_v59 }
 0x1ca   :  { %v481_v0 = vsel %vm55_vm0, %v451_v60, 0.0  ;;  %v404_v1 = vadd.f32 %v824_v61, %v1086_v31  ;;  %v398_v2 = vpop.f32.mrb[3].mxu1  ;;  %v570_v60 = vadd.s32 4294967272, %v1144_v45 }
 0x1cb   :  { %476 = vadd.xlane.f32.xlu1 %v475_v63  ;;  %v478_v3 = vsel %vm55_vm0, %v450_v62, 0.0  ;;  %v399_v4 = vadd.f32 %v1086_v31, %v398_v2  ;;  %v577_v63 = vadd.s32 4294967264, %v1144_v45 }
 0x1cc   :  { %482 = vadd.xlane.f32.xlu0 %v481_v0  ;;  %v453_v5 = vmul.f32 %v1091_v33, %v404_v1  ;;  %v573_v2 = vsub.s32 %v570_v60, %v1141_v44 }
 0x1cd   :  { %v827_v6 = vpop.f32.mrb[4].mxu1  ;;  %v452_v12 = vmul.f32 %v1091_v33, %v399_v4 }
 0x1ce   :  { %v414_v7 = vadd.f32 %v827_v6, %v1086_v31  ;;  %v408_v8 = vpop.f32.mrb[5].mxu1  ;;  %v487_v10 = vsel %vm55_vm0, %v453_v5, 0.0  ;;  %v580_v6 = vsub.s32 %v577_v63, %v1141_v44 }
 0x1cf   :  { %v409_v11 = vadd.f32 %v1086_v31, %v408_v8  ;;  %v484_v15 = vsel %vm55_vm0, %v452_v12, 0.0 }
 0x1d0   :  { %479 = vadd.xlane.f32.xlu0 %v478_v3  ;;  %v455_v9 = vmul.f32 %v1091_v33, %v414_v7  ;;  %v584_v3 = vadd.s32 4294967256, %v1144_v45 }
 0x1d1   :  { %v830_v13 = vpop.f32.mrb[6].mxu1  ;;  %v454_v17 = vmul.f32 %v1091_v33, %v409_v11 }
 0x1d2   :  { %v418_v14 = vpop.f32.mrb[7].mxu1  ;;  %v424_v16 = vadd.f32 %v830_v13, %v1086_v31  ;;  %v493_v35 = vsel %vm55_vm0, %v455_v9, 0.0  ;;  %v591_v9 = vadd.s32 4294967248, %v1144_v45  ;;  %v587_v12 = vsub.s32 %v584_v3, %v1141_v44 }
 0x1d3   :  { %v490_v21 = vsel %vm55_vm0, %v454_v17, 0.0  ;;  %v419_v22 = vadd.f32 %v1086_v31, %v418_v14 }
 0x1d4   :  { %488 = vadd.xlane.f32.xlu0 %v487_v10  ;;  %v457_v23 = vmul.f32 %v1091_v33, %v424_v16  ;;  %v594_v14 = vsub.s32 %v591_v9, %v1141_v44 }
 0x1d5   :  { %v833_v18 = vpop.f32.mrb[8].mxu1  ;;  %v456_v26 = vmul.f32 %v1091_v33, %v419_v22 }
 0x1d6   :  { %v428_v19 = vpop.f32.mrb[9].mxu1  ;;  %v499_v24 = vsel %vm55_vm0, %v457_v23, 0.0  ;;  %v434_v27 = vadd.f32 %v833_v18, %v1086_v31  ;;  %v605_v18 = vadd.s32 4294967232, %v1144_v45 }
 0x1d7   :  { %v429_v25 = vadd.f32 %v1086_v31, %v428_v19  ;;  %v496_v28 = vsel %vm55_vm0, %v456_v26, 0.0 }
 0x1d8   :  { %485 = vadd.xlane.f32.xlu0 %v484_v15  ;;  %v459_v32 = vmul.f32 %v1091_v33, %v434_v27  ;;  %v598_v15 = vadd.s32 4294967240, %v1144_v45  ;;  %v608_v26 = vsub.s32 %v605_v18, %v1141_v44 }
 0x1d9   :  { %v458_v29 = vmul.f32 %v1091_v33, %v429_v25  ;;  %v516_v33 = vsub.s32 0, %v1141_v44 }
 0x1da   :  { %v505_v34 = vsel %vm55_vm0, %v459_v32, 0.0 }
 0x1db   :  { %v502_v30 = vsel %vm55_vm0, %v458_v29, 0.0  ;;  %vm659_vm0 = vcmask 1048512  }
 0x1dc   :  { %511 = vperm.xlu1 %888, %v508_v20   ;;  %491 = vadd.xlane.f32.xlu0 %v490_v21  ;;  %v612_v21 = vadd.s32 4294967224, %v1144_v45 }
 0x1de   :  { %v615_v32 = vsub.s32 %v612_v21, %v1141_v44 }
 0x1e0   :  { %500 = vadd.xlane.f32.xlu0 %v499_v24  ;;  %v601_v24 = vsub.s32 %v598_v15, %v1141_v44 }
 0x1e4   :  { %497 = vadd.xlane.f32.xlu0 %v496_v28  ;;  %v619_v28 = vadd.s32 4294967216, %v1144_v45 }
 0x1e8   :  { %503 = vadd.xlane.f32.xlu0 %v502_v30 }
 0x1ec   :  { %506 = vadd.xlane.f32.xlu0 %v505_v34 }
 0x200   :  { %494 = vadd.xlane.f32.xlu1 %v493_v35  ;;  %v626_v35 = vadd.s32 4294967208, %v1144_v45 }
 0x24c   :  { %v465_v36 = vpop.xlane.xlu0 %464 }
 0x250   :  { %v462_v37 = vpop.xlane.xlu0 %461  ;;  %v471_v38 = vpop.xlane.xlu1 %470 }
 0x254   :  { %v468_v39 = vpop.xlane.xlu1 %467 }
 0x255   :  { %v474_v31 = vpop.xlane.xlu0 %473 }
 0x258   :  { %v477_v42 = vpop.xlane.xlu1 %476 }
 0x259   :  { %v483_v40 = vpop.xlane.xlu0 %482 }
 0x25c   :  { %v512_v46 = vpop.permute.xlu1 %511 }
 0x25d   :  { %v480_v43 = vpop.xlane.xlu0 %479  ;;  %v1146_v48 = vrot.slane %v512_v46, %v516_v33  ;;  %v629_v33 = vsub.s32 %v626_v35, %v1141_v44 }
 0x25f   :  { %v518_v52 = vadd.f32 %v1146_v48, %v462_v37  ;;  %v519_v53 = vadd.f32 %v1146_v48, %v465_v36  ;;  %v520_v56 = vadd.f32 %v1146_v48, %v468_v39  ;;  %v521_v0 = vadd.f32 %v1146_v48, %v471_v38 }
 0x260   :  { %v522_v4 = vadd.f32 %v1146_v48, %v474_v31  ;;  %v523_v10 = vadd.f32 %v1146_v48, %v477_v42  ;;  %v524_v17 = vadd.f32 %v1146_v48, %v480_v43  ;;  %v525_v23 = vadd.f32 %v1146_v48, %v483_v40 }
 0x261   :  { %v489_v47 = vpop.xlane.xlu0 %488  ;;  %v555_v58 = vrot.slane %v518_v52, %v554_v54  ;;  %v560_v59 = vrot.slane %v519_v53, %v559_v55  ;;  %v567_v62 = vrot.slane %v520_v56, %v566_v57  ;;  %v574_v8 = vrot.slane %v521_v0, %v573_v2 }
 0x262   :  { %v581_v13 = vrot.slane %v522_v4, %v580_v6  ;;  %v588_v20 = vrot.slane %v523_v10, %v587_v12  ;;  %v595_v25 = vrot.slane %v524_v17, %v594_v14  ;;  %v602_v34 = vrot.slane %v525_v23, %v601_v24 }
 0x263   :  { %v562_v1 = vsel %vm561_vm2, %v560_v59, %v555_v58  ;;  %v622_v37 = vsub.s32 %v619_v28, %v1141_v44  ;;  %v633_v31 = vadd.s32 4294967200, %v1144_v45  ;;  %v527_v39 = vadd.f32 %v1146_v48, %v489_v47 }
 0x264   :  { %v569_v5 = vsel %vm568_vm3, %v567_v62, %v562_v1  ;;  %v647_v42 = vadd.s32 4294967184, %v1144_v45  ;;  %v654_v43 = vadd.s32 4294967176, %v1144_v45  ;;  %v643_v54 = vsub.s32 %v640_v41, %v1141_v44 }
 0x265   :  { %v486_v51 = vpop.xlane.xlu0 %485  ;;  %v576_v11 = vsel %vm575_vm4, %v574_v8, %v569_v5  ;;  %v636_v50 = vsub.s32 %v633_v31, %v1141_v44  ;;  %v616_v53 = vrot.slane %v527_v39, %v615_v32 }
 0x266   :  { %v583_v16 = vsel %vm582_vm5, %v581_v13, %v576_v11  ;;  %v526_v27 = vadd.f32 %v1146_v48, %v486_v51  ;;  %v650_v45 = vsub.s32 %v647_v42, %v1141_v44  ;;  %v657_v58 = vsub.s32 %v654_v43, %v1141_v44 }
 0x267   :  { %v590_v22 = vsel %vm589_vm6, %v588_v20, %v583_v16 }
 0x268   :  { %v597_v29 = vsel %vm596_vm7, %v595_v25, %v590_v22  ;;  %v609_v36 = vrot.slane %v526_v27, %v608_v26 }
 0x269   :  { %v492_v61 = vpop.xlane.xlu0 %491  ;;  %v604_v40 = vsel %vm603_vm8, %v602_v34, %v597_v29 }
 0x26a   :  { %v528_v38 = vadd.f32 %v1146_v48, %v492_v61  ;;  %v611_v46 = vsel %vm610_vm9, %v609_v36, %v604_v40 }
 0x26b   :  { %v618_v59 = vsel %vm617_vm10, %v616_v53, %v611_v46 }
 0x26c   :  { %v623_v49 = vrot.slane %v528_v38, %v622_v37 }
 0x26d   :  { %v501_v7 = vpop.xlane.xlu0 %500 }
 0x26e   :  { %v531_v55 = vadd.f32 %v1146_v48, %v501_v7  ;;  %v625_v62 = vsel %vm624_vm11, %v623_v49, %v618_v59 }
 0x270   :  { %v644_v0 = vrot.slane %v531_v55, %v643_v54 }
 0x271   :  { %v498_v19 = vpop.xlane.xlu0 %497 }
 0x272   :  { %v530_v51 = vadd.f32 %v1146_v48, %v498_v19 }
 0x274   :  { %v637_v63 = vrot.slane %v530_v51, %v636_v50 }
 0x275   :  { %v504_v30 = vpop.xlane.xlu0 %503 }
 0x276   :  { %v532_v57 = vadd.f32 %v1146_v48, %v504_v30 }
 0x278   :  { %v651_v2 = vrot.slane %v532_v57, %v650_v45 }
 0x279   :  { %v507_v52 = vpop.xlane.xlu0 %506 }
 0x27a   :  { %v533_v60 = vadd.f32 %v1146_v48, %v507_v52 }
 0x27c   :  { %v658_v44 = vrot.slane %v533_v60, %v657_v58 }
 0x28d   :  { %v495_v47 = vpop.xlane.xlu1 %494 }
 0x28e   :  { %v529_v56 = vadd.f32 %v1146_v48, %v495_v47 }
 0x290   :  { %v630_v61 = vrot.slane %v529_v56, %v629_v33 }
 0x292   :  { %v632_v1 = vsel %vm631_vm12, %v630_v61, %v625_v62 }
 0x293   :  { %v639_v3 = vsel %vm638_vm13, %v637_v63, %v632_v1 }
 0x294   :  { %v646_v4 = vsel %vm645_vm14, %v644_v0, %v639_v3 }
 0x295   :  { %v653_v5 = vsel %vm652_vm15, %v651_v2, %v646_v4 }
 0x296   :  { %v660_v6 = vsel %vm659_vm0, %v658_v44, %v653_v5 }
 0x297   :  { %662 = vst [vmem:[#allocation3] sm:$0x1] %v660_v6 }
 0x298   :  { %901 = shalt.err (!%p898_p4)
}
 0x299   :  { %s902_s28 = scalar_lea.hbm %s1217_s7, 16 }
 0x29a   :  { %p903_p5 = scmp.ne.s32.totalorder %s1217_s7, %s902_s28  ;;  %p906_p6 = scmp.lt.u32.totalorder %s902_s28, %s1217_s7 }
 0x29c   :  { %p908_p7 = pnand %p906_p6, %p903_p5 }
 0x29e   :  { %911 = shalt.err (!%p908_p7)
}
 0x29f   :  { %672 = dma.vmem_to_hbm [thread:$0]  %s670_s5, 16, %s1217_s7, [#allocation4]  }
 0x2a0   :  { %912 = dma.done.wait [#allocation4], 16  }
 0x2a1   :  { %913 = vsyncadd [#allocation4], 4294967280 }
 0x2a2   :  { %676 = vsyncpa [#allocation4], 1 }

</bundles_post_ra>
